<compile_context>
chip_gen: v7x
topology: tpu7x:2x2x1
jax: 0.10.0
libtpu: 0.0.40
codegen_flags: <defaults>
</compile_context>

<pallas_src>
import jax
import jax.numpy as jnp
import numpy as np
from jax.experimental import pallas as pl
from jax.experimental.pallas import tpu as pltpu


def _round_up(x, m):
    return ((x + m - 1) // m) * m


def _make_transition_kernel(split_corners: bool, cin: int):
    """Kernel factory.

    split_corners=True  -> w-corner sum on the VPU via a lane-aligned slice add
                           (requires cin % 128 == 0); MXU contraction K = cin.
    split_corners=False -> stacked-weight path; w-corner sum folded into the
                           contraction (K = 2*cin).
    """

    def kernel(x_ref, scale_ref, shift_ref, w_ref, b_ref, o_ref):
        # x_ref:     (TR, 2, Wo, 2*Cin)   dim1 = h-corner; lanes = (w-corner, cin)
        # scale_ref: (1, 2*Cin)           folded BN scale, duplicated across the two w-corners
        # shift_ref: (1, 2*Cin)           folded BN shift, duplicated
        # w_ref:     (K, Cout_pad)        K = Cin (split) or 2*Cin (stacked); 0.25 pool factor folded
        # b_ref:     (1, Cout_pad)
        # o_ref:     (TR*Wo, Cout_pad)
        s = scale_ref[...].astype(jnp.float32)        # hoisted broadcasts (once per tile)
        t = shift_ref[...].astype(jnp.float32)
        xv = x_ref[...].astype(jnp.float32)           # BN/ReLU math in f32 on the VPU
        top = jnp.maximum(xv[:, 0] * s + t, 0.0)      # ReLU(BN(.)) h-corner 0
        bot = jnp.maximum(xv[:, 1] * s + t, 0.0)      # ReLU(BN(.)) h-corner 1
        y = top + bot                                 # (TR, Wo, 2*Cin)  h-corner sum (VPU)
        if split_corners:
            # lane-aligned w-corner sum (VPU) -> halves MXU contraction depth
            y = y[..., :cin] + y[..., cin:]           # (TR, Wo, Cin)
        tr, wo, k = y.shape
        y2d = y.reshape(tr * wo, k)                   # layout-free: Wo % 8 == 0 is guaranteed
        out = jnp.dot(y2d.astype(w_ref.dtype), w_ref[...],
                      preferred_element_type=jnp.float32)
        out = out + b_ref[...].astype(jnp.float32)
        o_ref[...] = out.astype(o_ref.dtype)

    return kernel


def transition_layer_forward(x_nchw, gamma, beta, conv_w, conv_b, *, eps=1e-5):
    """Forward pass matching PyTorch TransitionLayer (BatchNorm2d in training mode)."""
    N, C, H, W = x_nchw.shape
    Cout = conv_w.shape[0]
    assert H % 2 == 0 and W % 2 == 0, "avg_pool2d(2) path assumes even H, W"
    Ho, Wo = H // 2, W // 2

    # --- glue (XLA): one NCHW->NHWC transpose; BN batch stats on the NHWC copy ---
    # TODO(synk): fold the transpose + per-channel stats into a Pallas pre-kernel so x is read
    #             from HBM only twice (stats pass + main kernel) instead of 3-4x.
    x_nhwc = jnp.transpose(x_nchw, (0, 2, 3, 1))                 # (N, H, W, C)
    xf = x_nhwc.astype(jnp.float32)
    mean = jnp.mean(xf, axis=(0, 1, 2))                          # two-pass stats: numerically
    var = jnp.mean(jnp.square(xf - mean), axis=(0, 1, 2))        # robust, biased var (training BN)
    scale = gamma.astype(jnp.float32) * jax.lax.rsqrt(var + eps)
    shift = beta.astype(jnp.float32) - mean * scale

    # --- pad W so Wo_pad % 8 == 0 (free in-kernel reshape). Stats were computed pre-pad and the
    #     padded columns only reach padded output columns, which are sliced off below. ---
    Wo_pad = _round_up(Wo, 8)
    if Wo_pad != Wo:
        x_nhwc = jnp.pad(x_nhwc, ((0, 0), (0, 0), (0, 2 * Wo_pad - W), (0, 0)))
    R = N * Ho                      # output rows
    M = R * Wo_pad                  # (padded) output pixels

    xk = x_nhwc.reshape(R, 2, Wo_pad, 2 * C)                     # pure reshape, no data movement

    # --- fold pool factor into the conv weight; lane-dense (padded) Cout ---
    Cout_pad = _round_up(Cout, 128)
    w_mat = conv_w.reshape(Cout, C).T.astype(jnp.float32)        # (Cin, Cout)
    split_corners = (C % 128 == 0)                               # lane-aligned VPU corner add?
    if split_corners:
        wk = w_mat * 0.25                                        # K = Cin
    else:
        wk = jnp.concatenate([w_mat, w_mat], axis=0) * 0.25      # K = 2*Cin (w-corner in matmul)
    K = wk.shape[0]
    if Cout_pad != Cout:
        wk = jnp.pad(wk, ((0, 0), (0, Cout_pad - Cout)))
        bias = jnp.pad(conv_b.astype(jnp.float32), (0, Cout_pad - Cout))
    else:
        bias = conv_b.astype(jnp.float32)
    bias = bias.reshape(1, Cout_pad)

    scale2 = jnp.tile(scale, 2).reshape(1, 2 * C)                # duplicated across the w-corners
    shift2 = jnp.tile(shift, 2).reshape(1, 2 * C)

    # --- tile selection: generation-gated VMEM budget; >= 2 grid steps for v7x megacore ---
    try:
        vmem_cap = pltpu.get_tpu_info().vmem_capacity_bytes
    except Exception:
        vmem_cap = 64 << 20                                      # conservative (v7x-safe) fallback
    big_vmem = vmem_cap >= (96 << 20)                            # v5e/v6e: 128 MiB; v7x: 64 MiB
    in_buf_budget = (16 << 20) if big_vmem else (5 << 20)        # per input buffer (double-buffered)
    px_target = 2048 if big_vmem else 512                        # output pixels per grid step
    vmem_limit = (96 << 20) if big_vmem else (40 << 20)

    itemsize = jnp.dtype(x_nchw.dtype).itemsize
    bytes_per_row = 2 * Wo_pad * 2 * C * itemsize                # two image rows per output row
    tr_budget = max(1, in_buf_budget // max(bytes_per_row, 1))
    tr_target = max(1, -(-px_target // Wo_pad))
    tr = int(min(R, tr_budget, tr_target))
    if R >= 2:
        tr = min(tr, -(-R // 2))                                 # keep both v7x TCs busy (free on v5e/v6e)
    grid = (pl.cdiv(R, tr),)

    cost = pl.CostEstimate(
        flops=2 * M * K * Cout_pad,
        transcendentals=0,
        bytes_accessed=int(xk.size * itemsize + M * Cout_pad * itemsize
                           + wk.size * 4 + 4 * C * 4 + Cout_pad * 4),
    )

    kernel = _make_transition_kernel(split_corners, C)
    # TODO(synk): add pipeline_mode=pl.Buffered(3) on the x BlockSpec if profiling shows exposed
    #             DMA at tile boundaries (VMEM permitting on v7x).
    out_flat = pl.pallas_call(
        kernel,
        out_shape=jax.ShapeDtypeStruct((M, Cout_pad), x_nchw.dtype),
        grid_spec=pltpu.PrefetchScalarGridSpec(
            num_scalar_prefetch=0,
            grid=grid,
            in_specs=[
                pl.BlockSpec((tr, 2, Wo_pad, 2 * C), lambda i: (i, 0, 0, 0)),
                pl.BlockSpec((1, 2 * C), lambda i: (0, 0)),
                pl.BlockSpec((1, 2 * C), lambda i: (0, 0)),
                pl.BlockSpec((K, Cout_pad), lambda i: (0, 0)),
                pl.BlockSpec((1, Cout_pad), lambda i: (0, 0)),
            ],
            out_specs=pl.BlockSpec((tr * Wo_pad, Cout_pad), lambda i: (i, 0)),
        ),
        compiler_params=pltpu.CompilerParams(
            dimension_semantics=("parallel",),
            vmem_limit_bytes=vmem_limit,
        ),
        cost_estimate=cost,
    )(xk, scale2, shift2, wk, bias)

    # --- glue: unpad and return NCHW (the PyTorch module's output layout) ---
    # TODO(synk): in a real NHWC pipeline, return the NHWC slab directly and skip this transpose.
    out = out_flat.reshape(N, Ho, Wo_pad, Cout_pad)[:, :, :Wo, :Cout]
    return jnp.transpose(out, (0, 3, 1, 2))


def _reference_forward(x, gamma, beta, conv_w, conv_b, eps=1e-5):
    """Pure-JAX reference mirroring the PyTorch module (training-mode BN)."""
    mean = jnp.mean(x, axis=(0, 2, 3), keepdims=True)
    var = jnp.mean((x - mean) ** 2, axis=(0, 2, 3), keepdims=True)
    xn = (x - mean) / jnp.sqrt(var + eps)
    xn = xn * gamma[None, :, None, None] + beta[None, :, None, None]
    y = jnp.maximum(xn, 0.0)
    z = jnp.einsum("nchw,oc->nohw", y,
                   conv_w.reshape(conv_w.shape[0], conv_w.shape[1]),
                   precision=jax.lax.Precision.HIGHEST)
    z = z + conv_b[None, :, None, None]
    N, Co, H, W = z.shape
    z = z.reshape(N, Co, H // 2, 2, W // 2, 2).mean(axis=(3, 5))
    return z


if __name__ == "__main__":
    fwd = jax.jit(transition_layer_forward)

    def _run_case(name, N, Cin, H, W, Cout, case_id):
        key = jax.random.fold_in(jax.random.PRNGKey(0), case_id)
        k_x, k_g, k_b, k_w, k_cb = jax.random.split(key, 5)
        x = jax.random.normal(k_x, (N, Cin, H, W), dtype=jnp.float32)
        gamma = 1.0 + 0.1 * jax.random.normal(k_g, (Cin,), dtype=jnp.float32)
        beta = 0.1 * jax.random.normal(k_b, (Cin,), dtype=jnp.float32)
        conv_w = 0.1 * jax.random.normal(k_w, (Cout, Cin, 1, 1), dtype=jnp.float32)
        conv_b = 0.1 * jax.random.normal(k_cb, (Cout,), dtype=jnp.float32)

        out = jax.block_until_ready(fwd(x, gamma, beta, conv_w, conv_b))
        ref = _reference_forward(x, gamma, beta, conv_w, conv_b)
        assert out.shape == (N, Cout, H // 2, W // 2), (name, out.shape)
        np.testing.assert_allclose(np.asarray(out), np.asarray(ref), rtol=2e-5, atol=2e-5)

    # 1) stacked-weight path (Cin not lane-aligned); Cout padded 4 -> 128.
    _run_case("small", N=2, Cin=8, H=16, W=16, Cout=4, case_id=0)
    # 2) VPU corner-add path (Cin=128, K=Cin); W padded so Wo 6 -> 8; Cout padded 64 -> 128.
    _run_case("aligned", N=2, Cin=128, H=12, W=12, Cout=64, case_id=1)

    print("KERNEL_OK")
</pallas_src>

<mosaic_0001>
module attributes {stable_mosaic.version = 11 : i64} {
  func.func @kernel(%arg0: i32, %arg1: memref<8x2x8x16xf32, #tpu.memory_space<vmem>>, %arg2: memref<1x16xf32, #tpu.memory_space<vmem>>, %arg3: memref<1x16xf32, #tpu.memory_space<vmem>>, %arg4: memref<16x128xf32, #tpu.memory_space<vmem>>, %arg5: memref<1x128xf32, #tpu.memory_space<vmem>>, %arg6: memref<64x128xf32, #tpu.memory_space<vmem>>) attributes {dimension_semantics = [#tpu.dimension_semantics<parallel>], iteration_bounds = array<i64: 2>, scalar_prefetch = 0 : i64, scratch_operands = 0 : i64, tpu.core_type = #tpu.core_type<tc>, window_params = [{transform_indices = @transform_0, window_bounds = array<i64: 8, 2, 8, 16>}, {pipeline_mode = #tpu.pipeline_mode<synchronous>, transform_indices = @transform_1, window_bounds = array<i64: 1, 16>}, {pipeline_mode = #tpu.pipeline_mode<synchronous>, transform_indices = @transform_2, window_bounds = array<i64: 1, 16>}, {pipeline_mode = #tpu.pipeline_mode<synchronous>, transform_indices = @transform_3, window_bounds = array<i64: 16, 128>}, {pipeline_mode = #tpu.pipeline_mode<synchronous>, transform_indices = @transform_4, window_bounds = array<i64: 1, 128>}, {transform_indices = @transform_5, window_bounds = array<i64: 64, 128>}]} {
    %c0 = arith.constant 0 : index
    %c0_0 = arith.constant 0 : index
    %0 = vector.load %arg2[%c0, %c0_0] : memref<1x16xf32, #tpu.memory_space<vmem>>, vector<1x16xf32>
    %c0_1 = arith.constant 0 : index
    %c0_2 = arith.constant 0 : index
    %1 = vector.load %arg3[%c0_1, %c0_2] : memref<1x16xf32, #tpu.memory_space<vmem>>, vector<1x16xf32>
    %c0_3 = arith.constant 0 : index
    %c0_4 = arith.constant 0 : index
    %c0_5 = arith.constant 0 : index
    %c0_6 = arith.constant 0 : index
    %2 = vector.load %arg1[%c0_3, %c0_4, %c0_5, %c0_6] : memref<8x2x8x16xf32, #tpu.memory_space<vmem>>, vector<8x2x8x16xf32>
    %3 = vector.extract_strided_slice %2 {offsets = [0, 0, 0, 0], sizes = [8, 1, 8, 16], strides = [1, 1, 1, 1]} : vector<8x2x8x16xf32> to vector<8x1x8x16xf32>
    %4 = vector.shape_cast %3 : vector<8x1x8x16xf32> to vector<8x8x16xf32>
    %5 = vector.shape_cast %0 : vector<1x16xf32> to vector<1x1x16xf32>
    %6 = vector.broadcast %5 : vector<1x1x16xf32> to vector<8x8x16xf32>
    %7 = arith.mulf %4, %6 : vector<8x8x16xf32>
    %8 = vector.shape_cast %1 : vector<1x16xf32> to vector<1x1x16xf32>
    %9 = vector.broadcast %8 : vector<1x1x16xf32> to vector<8x8x16xf32>
    %10 = arith.addf %7, %9 : vector<8x8x16xf32>
    %cst = arith.constant 0.000000e+00 : f32
    %11 = vector.broadcast %cst : f32 to vector<8x8x16xf32>
    %12 = arith.maximumf %10, %11 : vector<8x8x16xf32>
    %13 = vector.extract_strided_slice %2 {offsets = [0, 1, 0, 0], sizes = [8, 1, 8, 16], strides = [1, 1, 1, 1]} : vector<8x2x8x16xf32> to vector<8x1x8x16xf32>
    %14 = vector.shape_cast %13 : vector<8x1x8x16xf32> to vector<8x8x16xf32>
    %15 = vector.shape_cast %0 : vector<1x16xf32> to vector<1x1x16xf32>
    %16 = vector.broadcast %15 : vector<1x1x16xf32> to vector<8x8x16xf32>
    %17 = arith.mulf %14, %16 : vector<8x8x16xf32>
    %18 = vector.shape_cast %1 : vector<1x16xf32> to vector<1x1x16xf32>
    %19 = vector.broadcast %18 : vector<1x1x16xf32> to vector<8x8x16xf32>
    %20 = arith.addf %17, %19 : vector<8x8x16xf32>
    %cst_7 = arith.constant 0.000000e+00 : f32
    %21 = vector.broadcast %cst_7 : f32 to vector<8x8x16xf32>
    %22 = arith.maximumf %20, %21 : vector<8x8x16xf32>
    %23 = arith.addf %12, %22 : vector<8x8x16xf32>
    %24 = vector.shape_cast %23 : vector<8x8x16xf32> to vector<64x16xf32>
    %c0_8 = arith.constant 0 : index
    %c0_9 = arith.constant 0 : index
    %25 = vector.load %arg4[%c0_8, %c0_9] : memref<16x128xf32, #tpu.memory_space<vmem>>, vector<16x128xf32>
    %cst_10 = arith.constant dense<0.000000e+00> : vector<64x128xf32>
    %26 = tpu.matmul %24, %25, %cst_10 {dimension_numbers = #tpu.dot_dimension_numbers<[1], [0], [0], [1], [0, 0, 1, 1], [], []>} : vector<64x16xf32>, vector<16x128xf32>, vector<64x128xf32> -> vector<64x128xf32>
    %c0_11 = arith.constant 0 : index
    %c0_12 = arith.constant 0 : index
    %27 = vector.load %arg5[%c0_11, %c0_12] : memref<1x128xf32, #tpu.memory_space<vmem>>, vector<1x128xf32>
    %28 = vector.broadcast %27 : vector<1x128xf32> to vector<64x128xf32>
    %29 = arith.addf %26, %28 : vector<64x128xf32>
    %c0_13 = arith.constant 0 : index
    %c0_14 = arith.constant 0 : index
    %30 = vector.load %arg6[%c0_13, %c0_14] : memref<64x128xf32, #tpu.memory_space<vmem>>, vector<64x128xf32>
    tpu.vector_store %arg6[%c0_13, %c0_14], %29 {strides = array<i32>} : memref<64x128xf32, #tpu.memory_space<vmem>>, vector<64x128xf32>,
    return
  }
  func.func @transform_0(%arg0: i32) -> (i32, i32, i32, i32) {
    %c0_i32 = arith.constant 0 : i32
    %c0_i32_0 = arith.constant 0 : i32
    %c0_i32_1 = arith.constant 0 : i32
    %c0_i32_2 = arith.constant 0 : i32
    return %arg0, %c0_i32, %c0_i32_0, %c0_i32_1 : i32, i32, i32, i32
  }
  func.func @transform_1(%arg0: i32) -> (i32, i32) {
    %c0_i32 = arith.constant 0 : i32
    %c0_i32_0 = arith.constant 0 : i32
    %c0_i32_1 = arith.constant 0 : i32
    return %c0_i32, %c0_i32_0 : i32, i32
  }
  func.func @transform_2(%arg0: i32) -> (i32, i32) {
    %c0_i32 = arith.constant 0 : i32
    %c0_i32_0 = arith.constant 0 : i32
    %c0_i32_1 = arith.constant 0 : i32
    return %c0_i32, %c0_i32_0 : i32, i32
  }
  func.func @transform_3(%arg0: i32) -> (i32, i32) {
    %c0_i32 = arith.constant 0 : i32
    %c0_i32_0 = arith.constant 0 : i32
    %c0_i32_1 = arith.constant 0 : i32
    return %c0_i32, %c0_i32_0 : i32, i32
  }
  func.func @transform_4(%arg0: i32) -> (i32, i32) {
    %c0_i32 = arith.constant 0 : i32
    %c0_i32_0 = arith.constant 0 : i32
    %c0_i32_1 = arith.constant 0 : i32
    return %c0_i32, %c0_i32_0 : i32, i32
  }
  func.func @transform_5(%arg0: i32) -> (i32, i32) {
    %c0_i32 = arith.constant 0 : i32
    %c0_i32_0 = arith.constant 0 : i32
    return %arg0, %c0_i32 : i32, i32
  }
}

</mosaic_0001>

<bundles_post_ra>
// kernel: tile.13
= control target key start
LH: loop header
LB: loop body
LE: loop exit
PB: predicated region body
PF: predicated region fallthrough
CT: control target
= control target key end

     0   :  { %s22_s0 = inlined_call_operand.vmem [shape: f32[8], index: 0, kind: input, shape index: {}]   ;;  %s23_s1 = inlined_call_operand.vmem [shape: f32[2,8], index: 1, kind: output, shape index: {}]  }
   0x1   :  { %v4_v0 = vld [vmem:[%s22_s0] ss:$0 sm:$0xff] }
   0x2   :  { %5 = vst [vmem:[%s23_s1] sm:$0x3] %v4_v0 }

// kernel: tile.14
= control target key start
LH: loop header
LB: loop body
LE: loop exit
PB: predicated region body
PF: predicated region fallthrough
CT: control target
= control target key end

     0   :  { %vm7_vm0 = vcmask 64512   ;;  %vm13_vm1 = vcmask 130112   ;;  %s39_s0 = inlined_call_operand.vmem [shape: f32[2,8], index: 0, kind: input, shape index: {}]   ;;  %s40_s1 = inlined_call_operand.vmem [shape: f32[1,16], index: 1, kind: output, shape index: {}]  }
   0x1   :  { %v4_v0 = vld [vmem:[%s39_s0] sm:$0x3]  ;;  %s22_s0 = smov 8  }
   0x2   :  { %5 = vst [vmem:[#allocation1] sm:$0x3] %v4_v0 }
   0x9   :  { %v10_v1 = vld [vmem:[#allocation1 + $0x1] sm:$0x1]   ;;  %v6_v2 = vld [vmem:[#allocation1] sm:$0x1]  }
   0xa   :  { %11 = vrot.lane.b32.xlu0 %v10_v1, %s22_s0  ;;  %8 = vst.msk [vmem:[#allocation0] sm:$0x1] %vm7_vm0, %v6_v2  }
  0x7c   :  { %v12_v3 = vpop.permute.xlu0 %11  }
  0x7d   :  { %14 = vst.msk [vmem:[#allocation0] sm:$0x1] %vm13_vm1, %v12_v3  }
  0x84   :  { %v18_v4 = vld [vmem:[#allocation0] sm:$0x1] }
  0x85   :  { %20 = vst [vmem:[%s40_s1] sm:$0x1] %v18_v4 }

// kernel: transition_layer_forward.1
= control target key start
LH: loop header
LB: loop body
LE: loop exit
PB: predicated region body
PF: predicated region fallthrough
CT: control target
= control target key end

     0   :  { %s622_s18 = smov 0   ;;  %s720_s0 = inlined_call_operand.vmem [shape: f32[16,2,8,16], index: 0, kind: input, shape index: {}]   ;;  %s721_s1 = inlined_call_operand.vmem [shape: f32[1,16], index: 1, kind: input, shape index: {}]   ;;  %s722_s2 = inlined_call_operand.vmem [shape: f32[1,16], index: 2, kind: input, shape index: {}]   ;;  %s723_s3 = inlined_call_operand.vmem [shape: f32[16,128], index: 3, kind: input, shape index: {}]   ;;  %s724_s4 = inlined_call_operand.vmem [shape: f32[1,128], index: 4, kind: input, shape index: {}]   ;;  %s725_s5 = inlined_call_operand.vmem [shape: f32[128,128], index: 5, kind: output, shape index: {}]  }
   0x1 LB: > { %s520_s19 = sadd.s32 4294967295, %s590_s18   ;;  %p524_p0 = scmp.ge.s32.totalorder %s590_s18, 1  ;;  %s590_s18 = sphi %s622_s18, %s15_s18  }
   0x2   : > { %p189_p1 = scmp.lt.s32.totalorder %s590_s18, 3 }
   0x4   : > { %p190_p2 = pnand %p524_p0, %p189_p1 }
   0x5   : > { %v317_v0 = vld [vmem:[%s723_s3] sm:$0xff] (!%p190_p2)  ;;  %v318_v1 = vld [vmem:[%s723_s3 + $0x8] sm:$0xff] (!%p190_p2)  ;;  %s525_s24 = sshll.u32 (!%p190_p2), %s520_s19, 3  ;;  %vm326_vm0 = vcmask (!%p190_p2), 130048  }
   0x6   : > { %193 = sbr.rel (%p190_p2) target bundleno = 252 (0xfc), region = 40  ;;  %v570_v2 = vpack.c.bf16 (!%p190_p2), %v318_v1, %v317_v0  ;;  %p219_p3 = scmp.lt.s32.totalorder (!%p190_p2), %s525_s24, 15  ;;  %v642_v3 = vld [vmem:[%s721_s1] ss:$0 sm:$0xff] (!%p190_p2) }
   0x7   : > { %v652_v4 = vld [vmem:[%s722_s2] ss:$0 sm:$0xff] (!%p190_p2) }
   0x8   : > { %571 = vmatprep.subr.bf16.mxu0 (!%p190_p2), %v570_v2  ;;  %574 = vmatprep.subr.bf16.mxu1 (!%p190_p2), %v570_v2 }
   0x9   : > { %573 = vmatpush3.bf16.msra.mxu0 (!%p190_p2), %v570_v2  ;;  %575 = vmatpush3.bf16.msra.mxu1 (!%p190_p2), %v570_v2 }
   0xd   : > { %s727_s24 = smov (!%p219_p3, %s525_s24), 15 }
   0xe   : > { %s543_s25 = sshll.u32 %s727_s24, 4  ;;  %s529_s8 = sshll.u32 %s727_s24, 3 }
   0xf   : > { %s647_s30 = scalar_lea.vmem %s720_s0, %s543_s25  ;;  %s229_s13 = scalar_lea.vmem %s725_s5, %s529_s8 }
  0x10   : > { %v233_v5 = vld [vmem:[%s647_s30] sm:$0xff]  ;;  %v234_v6 = vld [vmem:[%s647_s30 + $0x8] sm:$0xff]  ;;  %v235_v12 = vld [vmem:[%s647_s30 + $0x10] sm:$0xff] }
  0x11   : > { %v241_v7 = vld [vmem:[%s647_s30 + $0x40] sm:$0xff]  ;;  %v255_v8 = vmul.f32 %v642_v3, %v233_v5  ;;  %v285_v9 = vmul.f32 %v642_v3, %v234_v6  ;;  %v242_v10 = vld [vmem:[%s647_s30 + $0x48] sm:$0xff]  ;;  %v236_v13 = vld [vmem:[%s647_s30 + $0x18] sm:$0xff]  ;;  %v256_v15 = vmul.f32 %v642_v3, %v235_v12 }
  0x12   : > { %v259_v11 = vmul.f32 %v642_v3, %v241_v7  ;;  %v289_v14 = vmul.f32 %v642_v3, %v242_v10  ;;  %v286_v16 = vmul.f32 %v642_v3, %v236_v13  ;;  %v243_v17 = vld [vmem:[%s647_s30 + $0x50] sm:$0xff]  ;;  %v244_v18 = vld [vmem:[%s647_s30 + $0x58] sm:$0xff]  ;;  %v237_v27 = vld [vmem:[%s647_s30 + $0x20] sm:$0xff] }
  0x13   : > { %v269_v19 = vadd.f32 %v652_v4, %v255_v8  ;;  %v293_v20 = vadd.f32 %v652_v4, %v285_v9  ;;  %v260_v22 = vmul.f32 %v642_v3, %v243_v17  ;;  %v270_v24 = vadd.f32 %v652_v4, %v256_v15  ;;  %v238_v28 = vld [vmem:[%s647_s30 + $0x28] sm:$0xff]  ;;  %v245_v33 = vld [vmem:[%s647_s30 + $0x60] sm:$0xff]  ;;  %v239_v39 = vld [vmem:[%s647_s30 + $0x30] sm:$0xff] }
  0x14   : > { %v273_v21 = vadd.f32 %v652_v4, %v259_v11  ;;  %v297_v23 = vadd.f32 %v652_v4, %v289_v14  ;;  %v294_v25 = vadd.f32 %v652_v4, %v286_v16  ;;  %v290_v26 = vmul.f32 %v642_v3, %v244_v18  ;;  %v246_v38 = vld [vmem:[%s647_s30 + $0x68] sm:$0xff]  ;;  %v240_v44 = vld [vmem:[%s647_s30 + $0x38] sm:$0xff]  ;;  %v247_v53 = vld [vmem:[%s647_s30 + $0x70] sm:$0xff] }
  0x15   : > { %v277_v29 = vmax.f32 %v269_v19, 0.0  ;;  %v301_v30 = vmax.f32 %v293_v20, 0.0  ;;  %v274_v32 = vadd.f32 %v652_v4, %v260_v22  ;;  %v278_v35 = vmax.f32 %v270_v24, 0.0  ;;  %v248_v54 = vld [vmem:[%s647_s30 + $0x78] sm:$0xff]  ;;  %v532_v14 = vld [vmem:[%s724_s4] ss:$0 sm:$0xff] }
  0x16   : > { %v281_v31 = vmax.f32 %v273_v21, 0.0  ;;  %v305_v34 = vmax.f32 %v297_v23, 0.0  ;;  %v302_v36 = vmax.f32 %v294_v25, 0.0  ;;  %v298_v37 = vadd.f32 %v652_v4, %v290_v26 }
  0x17   : > { %v309_v40 = vadd.f32 %v301_v30, %v277_v29  ;;  %v282_v41 = vmax.f32 %v274_v32, 0.0  ;;  %v257_v42 = vmul.f32 %v642_v3, %v237_v27  ;;  %v287_v43 = vmul.f32 %v642_v3, %v238_v28 }
  0x18   : > { %v313_v45 = vadd.f32 %v305_v34, %v281_v31  ;;  %v310_v46 = vadd.f32 %v302_v36, %v278_v35  ;;  %v306_v47 = vmax.f32 %v298_v37, 0.0  ;;  %v261_v48 = vmul.f32 %v642_v3, %v245_v33 }
  0x19   : > { %558 = vmatprep.mubr.msk.f32.mxu0 %vm326_vm0, %v309_v40  ;;  %v271_v49 = vadd.f32 %v652_v4, %v257_v42  ;;  %v295_v50 = vadd.f32 %v652_v4, %v287_v43  ;;  %v291_v51 = vmul.f32 %v642_v3, %v246_v38  ;;  %v258_v52 = vmul.f32 %v642_v3, %v239_v39 }
  0x1a   : > { %564 = vmatprep.mubr.msk.f32.mxu1 %vm326_vm0, %v313_v45  ;;  %559 = vmatmul.mubr.msk.f32.vlgmr.msra.gmra.mrb[0].mxu0 %vm326_vm0, %v310_v46  ;;  %v314_v55 = vadd.f32 %v306_v47, %v282_v41  ;;  %v275_v56 = vadd.f32 %v652_v4, %v261_v48  ;;  %v288_v57 = vmul.f32 %v642_v3, %v240_v44 }
  0x1b   : > { %v279_v58 = vmax.f32 %v271_v49, 0.0  ;;  %v303_v59 = vmax.f32 %v295_v50, 0.0  ;;  %v299_v60 = vadd.f32 %v652_v4, %v291_v51  ;;  %v272_v61 = vadd.f32 %v652_v4, %v258_v52 }
  0x1c   : > { %565 = vmatmul.mubr.msk.f32.vlgmr.msra.gmra.mrb[0].mxu1 %vm326_vm0, %v314_v55  ;;  %v283_v62 = vmax.f32 %v275_v56, 0.0  ;;  %v296_v63 = vadd.f32 %v652_v4, %v288_v57  ;;  %v262_v0 = vmul.f32 %v642_v3, %v247_v53  ;;  %v292_v1 = vmul.f32 %v642_v3, %v248_v54 }
  0x1d   : > { %v311_v2 = vadd.f32 %v303_v59, %v279_v58  ;;  %v307_v5 = vmax.f32 %v299_v60, 0.0  ;;  %v280_v6 = vmax.f32 %v272_v61, 0.0 }
  0x1e   : > { %v304_v7 = vmax.f32 %v296_v63, 0.0  ;;  %v276_v8 = vadd.f32 %v652_v4, %v262_v0  ;;  %v300_v9 = vadd.f32 %v652_v4, %v292_v1 }
  0x1f   : > { %561 = vmatprep.mubr.msk.f32.mxu0 %vm326_vm0, %v311_v2  ;;  %v315_v10 = vadd.f32 %v307_v5, %v283_v62 }
  0x20   : > { %v312_v11 = vadd.f32 %v304_v7, %v280_v6  ;;  %v284_v12 = vmax.f32 %v276_v8, 0.0  ;;  %v308_v13 = vmax.f32 %v300_v9, 0.0 }
  0x21   : > { %567 = vmatprep.mubr.msk.f32.mxu1 %vm326_vm0, %v315_v10 }
  0x22   : > { %562 = vmatmul.mubr.msk.f32.gmra.mrb[2].mxu0 %vm326_vm0, %v312_v11  ;;  %v316_v3 = vadd.f32 %v308_v13, %v284_v12 }
  0x24   : > { %568 = vmatmul.mubr.msk.f32.gmra.mrb[2].mxu1 %vm326_vm0, %v316_v3 }
  0xed   : > { %v560_v4 = vpop.f32.mrb[0].mxu0 }
  0xee   : > { %v423_v15 = vadd.f32 %v560_v4, %v532_v14  ;;  %v417_v16 = vpop.f32.mrb[1].mxu0 }
  0xef   : > { %v566_v17 = vpop.f32.mrb[0].mxu1  ;;  %v418_v18 = vadd.f32 %v532_v14, %v417_v16 }
  0xf0   : > { %457 = vst [vmem:[%s229_s13 + $0x8] sm:$0xff] %v423_v15  ;;  %v443_v19 = vadd.f32 %v566_v17, %v532_v14  ;;  %v437_v20 = vpop.f32.mrb[1].mxu1 }
  0xf1   : > { %456 = vst [vmem:[%s229_s13] sm:$0xff] %v418_v18  ;;  %v438_v21 = vadd.f32 %v532_v14, %v437_v20 }
  0xf2   : > { %461 = vst [vmem:[%s229_s13 + $0x28] sm:$0xff] %v443_v19 }
  0xf3   : > { %460 = vst [vmem:[%s229_s13 + $0x20] sm:$0xff] %v438_v21 }
  0xf5   : > { %v563_v22 = vpop.f32.mrb[2].mxu0 }
  0xf6   : > { %v433_v23 = vadd.f32 %v563_v22, %v532_v14  ;;  %v427_v24 = vpop.f32.mrb[3].mxu0 }
  0xf7   : > { %v569_v25 = vpop.f32.mrb[2].mxu1  ;;  %v428_v26 = vadd.f32 %v532_v14, %v427_v24 }
  0xf8   : > { %459 = vst [vmem:[%s229_s13 + $0x18] sm:$0xff] %v433_v23  ;;  %v453_v27 = vadd.f32 %v569_v25, %v532_v14  ;;  %v447_v28 = vpop.f32.mrb[3].mxu1 }
  0xf9   : > { %458 = vst [vmem:[%s229_s13 + $0x10] sm:$0xff] %v428_v26  ;;  %v448_v29 = vadd.f32 %v532_v14, %v447_v28 }
  0xfa   : > { %463 = vst [vmem:[%s229_s13 + $0x38] sm:$0xff] %v453_v27 }
  0xfb   : > { %462 = vst [vmem:[%s229_s13 + $0x30] sm:$0xff] %v448_v29 }
  0xfc PF: > { %s15_s18 = sadd.s32 1, %s590_s18  }
  0xfd   : > { %p12_p4 = scmp.ge.s32.totalorder %s15_s18, 4  }
  0xff   :  { %14 = sbr.rel (!%p12_p4) target bundleno = 1 (0x1), region = 70 }

</bundles_post_ra>
